<compile_context>
chip_gen: v7x
topology: tpu7x:2x2x1
jax: 0.10.0
libtpu: 0.0.40
codegen_flags: <defaults>
</compile_context>

<pallas_src>
import functools

import jax
import jax.numpy as jnp
from jax.experimental import pallas as pl
from jax.experimental.pallas import tpu as pltpu


def _round_up(x, m):
    return (x + m - 1) // m * m


def _pick_tm(m, tm_max):
    """Row tile: multiple of 8, capped, >=2 grid steps when possible (v7x has 2 TCs)."""
    if m <= 16:
        return m
    return min(tm_max, _round_up((m + 1) // 2, 8))


_VMEM_LIMIT = 32 * 1024 * 1024      # safe on v5e/v6e (128 MiB) and v7x (64 MiB)


# ---------------- fused v + attn projection (two lane-padded outputs) ---------------- #

def _fused_va_kernel(x_ref, wv_ref, bv_ref, wa_ref, ba_ref, v_ref, a_ref):
    xb = x_ref[...].astype(jnp.bfloat16)           # in-kernel cast (hides under MXU)
    v = jnp.dot(xb, wv_ref[...], preferred_element_type=jnp.float32) + bv_ref[...]
    a = jnp.dot(xb, wa_ref[...], preferred_element_type=jnp.float32) + ba_ref[...]
    v_ref[...] = v.astype(v_ref.dtype)
    a_ref[...] = a.astype(a_ref.dtype)


def pallas_fused_va(x2d, wv, bv, wa, ba, *, tm_max=1024):
    """x:(M,Cin) -> (v:(M,Nv) bf16, a:(M,Na) bf16); Nv, Na multiples of 128."""
    m, cin = x2d.shape
    nv, na = wv.shape[1], wa.shape[1]
    tm = _pick_tm(m, tm_max)
    grid = (pl.cdiv(m, tm),)
    cost = pl.CostEstimate(
        flops=2 * m * cin * (nv + na), transcendentals=0,
        bytes_accessed=4 * m * cin + 2 * cin * (nv + na) + 2 * m * (nv + na))
    return pl.pallas_call(
        _fused_va_kernel,
        out_shape=(jax.ShapeDtypeStruct((m, nv), jnp.bfloat16),
                   jax.ShapeDtypeStruct((m, na), jnp.bfloat16)),
        grid=grid,
        in_specs=[pl.BlockSpec((tm, cin), lambda i: (i, 0)),
                  pl.BlockSpec((cin, nv), lambda i: (0, 0)),   # constant index -> DMA'd once
                  pl.BlockSpec((1, nv), lambda i: (0, 0)),
                  pl.BlockSpec((cin, na), lambda i: (0, 0)),
                  pl.BlockSpec((1, na), lambda i: (0, 0))],
        out_specs=(pl.BlockSpec((tm, nv), lambda i: (i, 0)),
                   pl.BlockSpec((tm, na), lambda i: (i, 0))),
        compiler_params=pltpu.CompilerParams(
            dimension_semantics=("parallel",),
            vmem_limit_bytes=_VMEM_LIMIT),
        cost_estimate=cost,
    )(x2d, wv, bv, wa, ba)


# ------------------------------- proj linear (MXU) ----------------------------------- #

def _linear_kernel(x_ref, w_ref, b_ref, o_ref):
    xb = x_ref[...].astype(jnp.bfloat16)
    acc = jnp.dot(xb, w_ref[...], preferred_element_type=jnp.float32) + b_ref[...]
    o_ref[...] = acc.astype(o_ref.dtype)


def pallas_linear(x2d, wt, b_row, *, out_dtype=jnp.float32, tm_max=1024):
    m, cin = x2d.shape
    n = wt.shape[1]
    tm = _pick_tm(m, tm_max)
    grid = (pl.cdiv(m, tm),)
    cost = pl.CostEstimate(
        flops=2 * m * cin * n, transcendentals=0,
        bytes_accessed=int(x2d.dtype.itemsize) * m * cin + 2 * cin * n + 4 * m * n)
    return pl.pallas_call(
        _linear_kernel,
        out_shape=jax.ShapeDtypeStruct((m, n), out_dtype),
        grid=grid,
        in_specs=[pl.BlockSpec((tm, cin), lambda i: (i, 0)),
                  pl.BlockSpec((cin, n), lambda i: (0, 0)),
                  pl.BlockSpec((1, n), lambda i: (0, 0))],
        out_specs=pl.BlockSpec((tm, n), lambda i: (i, 0)),
        compiler_params=pltpu.CompilerParams(
            dimension_semantics=("parallel",),
            vmem_limit_bytes=_VMEM_LIMIT),
        cost_estimate=cost,
    )(x2d, wt, b_row)


# ----------- fused unfold -> scale -> softmax -> attn@v -> fold (lane-dense) ---------- #

def _outlook_core_kernel(a_ref, v_ref, o_ref, vpad_ref, acc_ref, *,
                         scale, K, P, H, W, nh, hd):
    # a_ref : (H, W, Ap) bf16 — logits, lane layout [i, j, n] (n fastest); pad lanes unused
    # v_ref : (H, W, Cp) bf16 — values, lane layout [n, d]; pad lanes unused
    # o_ref : (H, W, C)  bf16 — folded output for this image
    # vpad_ref : (H+2P, W+2P, C) f32 scratch — halo-padded v (pad done in VMEM, not HBM)
    # acc_ref  : (H+2P, W+2P, C) f32 scratch — fold accumulator
    KK = K * K
    C = nh * hd

    vpad_ref[...] = jnp.zeros_like(vpad_ref)
    vpad_ref[P:P + H, P:P + W, :] = v_ref[:, :, :C].astype(jnp.float32)
    acc_ref[...] = jnp.zeros_like(acc_ref)

    vp = vpad_ref[...]
    # The KK source taps: shifted channels-last views of padded v (all heads on lanes).
    taps = [vp[j // K:j // K + H, j % K:j % K + W, :] for j in range(KK)]

    a = a_ref[...].astype(jnp.float32) * scale            # (H, W, Ap), scaled once

    for i in range(KK):                                   # output tap (fold position)
        ir, ic = i // K, i % K
        base = i * KK * nh
        # Logits for this output tap: KK contiguous (H, W, nh) lane slabs (one per source).
        logit = [a[:, :, base + j * nh: base + (j + 1) * nh] for j in range(KK)]
        m = logit[0]
        for j in range(1, KK):
            m = jnp.maximum(m, logit[j])
        e = [jnp.exp(l - m) for l in logit]                # EUP
        tot = e[0]
        for j in range(1, KK):
            tot = tot + e[j]
        rinv = pl.reciprocal(tot, approx=True)             # EUP, off the VALU slot

        contrib = None
        for j in range(KK):
            w = e[j] * rinv                                # (H, W, nh) softmax prob
            # Broadcast each head's prob over its hd channels -> (H, W, C), lane-dense.
            wb = jnp.concatenate(
                [jnp.broadcast_to(w[:, :, n:n + 1], (H, W, hd)) for n in range(nh)],
                axis=-1)
            t = wb * taps[j]
            contrib = t if contrib is None else contrib + t
        # fold: patch (y, x), output tap (ir, ic) lands at padded position (y+ir, x+ic)
        acc_ref[ir:ir + H, ic:ic + W, :] += contrib

    o_ref[...] = acc_ref[P:P + H, P:P + W, :].astype(o_ref.dtype)


def pallas_outlook_core(a4, v4, *, scale, K, P, H, W, nh, hd):
    """a4:(B,H,W,Ap) bf16 ([i,j,n] lanes), v4:(B,H,W,Cp) bf16 -> (B,H,W,C) bf16."""
    B = a4.shape[0]
    Ap, Cp = a4.shape[-1], v4.shape[-1]
    C = nh * hd
    Hp, Wp = H + 2 * P, W + 2 * P
    return pl.pallas_call(
        functools.partial(_outlook_core_kernel, scale=scale, K=K, P=P, H=H, W=W,
                          nh=nh, hd=hd),
        out_shape=jax.ShapeDtypeStruct((B, H, W, C), jnp.bfloat16),
        grid=(B,),
        in_specs=[pl.BlockSpec((None, H, W, Ap), lambda b: (b, 0, 0, 0)),
                  pl.BlockSpec((None, H, W, Cp), lambda b: (b, 0, 0, 0))],
        out_specs=pl.BlockSpec((None, H, W, C), lambda b: (b, 0, 0, 0)),
        scratch_shapes=[pltpu.VMEM((Hp, Wp, C), jnp.float32),
                        pltpu.VMEM((Hp, Wp, C), jnp.float32)],
        compiler_params=pltpu.CompilerParams(
            dimension_semantics=("parallel",),
            vmem_limit_bytes=_VMEM_LIMIT),
    )(a4, v4)


# ---------------------------------- Module wrapper ----------------------------------- #

class OutlookAttentionPallas:
    def __init__(self, dim, num_heads, kernel_size=3, padding=1, stride=1,
                 qkv_bias=False, qk_scale=None, key=None):
        # TODO(synk): stride > 1 (AvgPool2d + strided fold) not implemented;
        #             attn_drop / proj_drop default to 0.0 (identity) and are omitted.
        assert stride == 1, "only stride=1 (module default) is supported"
        assert dim % num_heads == 0
        head_dim = dim // num_heads
        self.dim = dim
        self.num_heads = num_heads
        self.head_dim = head_dim
        self.kernel_size = kernel_size
        self.padding = padding
        self.stride = stride
        self.scale = qk_scale or head_dim ** (-0.5)

        KK = kernel_size * kernel_size
        K4nh = kernel_size ** 4 * num_heads
        self.K4nh = K4nh

        k1, k2, k3, k4, k5 = jax.random.split(key, 5)
        s = 0.02
        # PyTorch-layout parameters (f32) — used by the pure-JAX reference.
        self.w_v = s * jax.random.normal(k1, (dim, dim), jnp.float32)
        self.b_v = jnp.zeros((dim,), jnp.float32)               # qkv_bias=False
        self.w_attn = s * jax.random.normal(k2, (K4nh, dim), jnp.float32)
        self.b_attn = s * jax.random.normal(k3, (K4nh,), jnp.float32)
        self.w_proj = s * jax.random.normal(k4, (dim, dim), jnp.float32)
        self.b_proj = s * jax.random.normal(k5, (dim,), jnp.float32)

        # --- kernel-side parameters ---
        # v projection: transposed, lane-padded to x128, bf16.
        self.Cp = _round_up(dim, 128)
        wv = jnp.zeros((dim, self.Cp), jnp.float32).at[:, :dim].set(self.w_v.T)
        self.wt_v = wv.astype(jnp.bfloat16)
        self.bv_row = jnp.zeros((1, self.Cp), jnp.float32).at[0, :dim].set(self.b_v)

        # attn projection: columns permuted from PyTorch's [n, i, j] layout to the
        # kernel's lane-friendly [i, j, n] layout, transposed, lane-padded, bf16.
        nh = num_heads
        perm = jnp.array([n * KK * KK + i * KK + j
                          for i in range(KK) for j in range(KK) for n in range(nh)],
                         dtype=jnp.int32)
        self.Ap = _round_up(K4nh, 128)
        wa = (jnp.zeros((dim, self.Ap), jnp.float32)
              .at[:, :K4nh].set(self.w_attn[perm].T))
        self.wt_attn = wa.astype(jnp.bfloat16)
        self.ba_row = (jnp.zeros((1, self.Ap), jnp.float32)
                       .at[0, :K4nh].set(self.b_attn[perm]))

        # output projection: transposed, bf16 (output width = dim, no pad -> exact shape).
        self.wt_proj = self.w_proj.T.astype(jnp.bfloat16)
        self.b_proj_row = self.b_proj.reshape(1, dim)

    def __call__(self, x):
        B, H, W, C = x.shape
        assert C == self.dim
        K, P = self.kernel_size, self.padding
        nh, hd = self.num_heads, self.head_dim
        M = B * H * W

        # fused v + attn projection: two lane-padded bf16 outputs (no concat/slice).
        v2d, a2d = pallas_fused_va(x.reshape(M, C), self.wt_v, self.bv_row,
                                   self.wt_attn, self.ba_row)
        v4 = v2d.reshape(B, H, W, self.Cp)        # free reshapes; no head transposes
        a4 = a2d.reshape(B, H, W, self.Ap)

        # fused unfold -> scale -> softmax -> attn@v -> fold (lane-dense hot path).
        folded = pallas_outlook_core(a4, v4, scale=self.scale, K=K, P=P, H=H, W=W,
                                     nh=nh, hd=hd)             # (B, H, W, C) bf16

        # output projection.
        y = pallas_linear(folded.reshape(M, C), self.wt_proj, self.b_proj_row)
        return y.reshape(B, H, W, C)


# ------------------------------- pure-JAX reference ----------------------------------- #

def reference_forward(mod, x):
    """Pure-JAX reference of the PyTorch module (matmul operands bf16, f32 accumulate)."""
    B, H, W, C = x.shape
    K, P = mod.kernel_size, mod.padding
    nh = mod.num_heads
    hd = C // nh
    KK = K * K

    def lin(x2d, w, b):
        return jnp.dot(x2d.astype(jnp.bfloat16), w.T.astype(jnp.bfloat16),
                       preferred_element_type=jnp.float32) + b

    v = lin(x.reshape(-1, C), mod.w_v, mod.b_v).reshape(B, H, W, C)
    v_pad = jnp.pad(v, ((0, 0), (P, P), (P, P), (0, 0)))
    patches = jnp.stack(
        [v_pad[:, ki:ki + H, kj:kj + W, :] for ki in range(K) for kj in range(K)], axis=3)
    v_unf = patches.reshape(B, H * W, KK, nh, hd).transpose(0, 3, 1, 2, 4)
    a = lin(x.reshape(-1, C), mod.w_attn, mod.b_attn)
    a = a.reshape(B, H * W, nh, KK, KK).transpose(0, 2, 1, 3, 4) * mod.scale
    a = jax.nn.softmax(a, axis=-1)
    o = jnp.einsum("bnlij,bnljd->bnlid", a, v_unf)
    o = o.transpose(0, 2, 3, 1, 4).reshape(B, H, W, KK, C)
    acc = jnp.zeros((B, H + 2 * P, W + 2 * P, C), jnp.float32)
    for ki in range(K):
        for kj in range(K):
            acc = acc.at[:, ki:ki + H, kj:kj + W, :].add(o[:, :, :, ki * K + kj, :])
    folded = acc[:, P:P + H, P:P + W, :]
    y = lin(folded.reshape(-1, C), mod.w_proj, mod.b_proj)
    return y.reshape(B, H, W, C)


# --------------------------------------- main ----------------------------------------- #

if __name__ == "__main__":
    key = jax.random.PRNGKey(0)
    kx, kp = jax.random.split(key)
    B, H, W, C = 2, 8, 8, 32          # dim=32, num_heads=2, head_dim=16
    x = jax.random.normal(kx, (B, H, W, C), jnp.float32)

    mod = OutlookAttentionPallas(dim=C, num_heads=2, kernel_size=3,
                                 padding=1, stride=1, key=kp)

    y = jax.block_until_ready(mod(x))
    assert y.shape == (B, H, W, C)

    y_ref = reference_forward(mod, x)
    max_err = float(jnp.max(jnp.abs(y - y_ref)))
    if not jnp.allclose(y, y_ref, atol=2e-3, rtol=2e-3):
        raise AssertionError(f"Pallas output does not match reference (max |err| = {max_err:.3e})")

    print("KERNEL_OK")
</pallas_src>

<mosaic_0001>
module attributes {stable_mosaic.version = 11 : i64} {
  func.func @_fused_va_kernel(%arg0: i32, %arg1: memref<64x32xf32, #tpu.memory_space<vmem>>, %arg2: memref<32x128xbf16, #tpu.memory_space<vmem>>, %arg3: memref<1x128xf32, #tpu.memory_space<vmem>>, %arg4: memref<32x256xbf16, #tpu.memory_space<vmem>>, %arg5: memref<1x256xf32, #tpu.memory_space<vmem>>, %arg6: memref<64x128xbf16, #tpu.memory_space<vmem>>, %arg7: memref<64x256xbf16, #tpu.memory_space<vmem>>) attributes {dimension_semantics = [#tpu.dimension_semantics<parallel>], iteration_bounds = array<i64: 2>, scalar_prefetch = 0 : i64, scratch_operands = 0 : i64, tpu.core_type = #tpu.core_type<tc>, window_params = [{transform_indices = @transform_0, window_bounds = array<i64: 64, 32>}, {pipeline_mode = #tpu.pipeline_mode<synchronous>, transform_indices = @transform_1, window_bounds = array<i64: 32, 128>}, {pipeline_mode = #tpu.pipeline_mode<synchronous>, transform_indices = @transform_2, window_bounds = array<i64: 1, 128>}, {pipeline_mode = #tpu.pipeline_mode<synchronous>, transform_indices = @transform_3, window_bounds = array<i64: 32, 256>}, {pipeline_mode = #tpu.pipeline_mode<synchronous>, transform_indices = @transform_4, window_bounds = array<i64: 1, 256>}, {transform_indices = @transform_5, window_bounds = array<i64: 64, 128>}, {transform_indices = @transform_6, window_bounds = array<i64: 64, 256>}]} {
    %c0 = arith.constant 0 : index
    %c0_0 = arith.constant 0 : index
    %0 = vector.load %arg1[%c0, %c0_0] : memref<64x32xf32, #tpu.memory_space<vmem>>, vector<64x32xf32>
    %1 = arith.truncf %0 : vector<64x32xf32> to vector<64x32xbf16>
    %c0_1 = arith.constant 0 : index
    %c0_2 = arith.constant 0 : index
    %2 = vector.load %arg2[%c0_1, %c0_2] : memref<32x128xbf16, #tpu.memory_space<vmem>>, vector<32x128xbf16>
    %cst = arith.constant dense<0.000000e+00> : vector<64x128xf32>
    %3 = tpu.matmul %1, %2, %cst {dimension_numbers = #tpu.dot_dimension_numbers<[1], [0], [0], [1], [0, 0, 1, 1], [], []>} : vector<64x32xbf16>, vector<32x128xbf16>, vector<64x128xf32> -> vector<64x128xf32>
    %c0_3 = arith.constant 0 : index
    %c0_4 = arith.constant 0 : index
    %4 = vector.load %arg3[%c0_3, %c0_4] : memref<1x128xf32, #tpu.memory_space<vmem>>, vector<1x128xf32>
    %5 = vector.broadcast %4 : vector<1x128xf32> to vector<64x128xf32>
    %6 = arith.addf %3, %5 : vector<64x128xf32>
    %c0_5 = arith.constant 0 : index
    %c0_6 = arith.constant 0 : index
    %7 = vector.load %arg4[%c0_5, %c0_6] : memref<32x256xbf16, #tpu.memory_space<vmem>>, vector<32x256xbf16>
    %cst_7 = arith.constant dense<0.000000e+00> : vector<64x256xf32>
    %8 = tpu.matmul %1, %7, %cst_7 {dimension_numbers = #tpu.dot_dimension_numbers<[1], [0], [0], [1], [0, 0, 1, 1], [], []>} : vector<64x32xbf16>, vector<32x256xbf16>, vector<64x256xf32> -> vector<64x256xf32>
    %c0_8 = arith.constant 0 : index
    %c0_9 = arith.constant 0 : index
    %9 = vector.load %arg5[%c0_8, %c0_9] : memref<1x256xf32, #tpu.memory_space<vmem>>, vector<1x256xf32>
    %10 = vector.broadcast %9 : vector<1x256xf32> to vector<64x256xf32>
    %11 = arith.addf %8, %10 : vector<64x256xf32>
    %12 = arith.truncf %6 : vector<64x128xf32> to vector<64x128xbf16>
    %c0_10 = arith.constant 0 : index
    %c0_11 = arith.constant 0 : index
    %13 = vector.load %arg6[%c0_10, %c0_11] : memref<64x128xbf16, #tpu.memory_space<vmem>>, vector<64x128xbf16>
    tpu.vector_store %arg6[%c0_10, %c0_11], %12 {strides = array<i32>} : memref<64x128xbf16, #tpu.memory_space<vmem>>, vector<64x128xbf16>,
    %14 = arith.truncf %11 : vector<64x256xf32> to vector<64x256xbf16>
    %c0_12 = arith.constant 0 : index
    %c0_13 = arith.constant 0 : index
    %15 = vector.load %arg7[%c0_12, %c0_13] : memref<64x256xbf16, #tpu.memory_space<vmem>>, vector<64x256xbf16>
    tpu.vector_store %arg7[%c0_12, %c0_13], %14 {strides = array<i32>} : memref<64x256xbf16, #tpu.memory_space<vmem>>, vector<64x256xbf16>,
    return
  }
  func.func @transform_0(%arg0: i32) -> (i32, i32) {
    %c0_i32 = arith.constant 0 : i32
    %c0_i32_0 = arith.constant 0 : i32
    return %arg0, %c0_i32 : i32, i32
  }
  func.func @transform_1(%arg0: i32) -> (i32, i32) {
    %c0_i32 = arith.constant 0 : i32
    %c0_i32_0 = arith.constant 0 : i32
    %c0_i32_1 = arith.constant 0 : i32
    return %c0_i32, %c0_i32_0 : i32, i32
  }
  func.func @transform_2(%arg0: i32) -> (i32, i32) {
    %c0_i32 = arith.constant 0 : i32
    %c0_i32_0 = arith.constant 0 : i32
    %c0_i32_1 = arith.constant 0 : i32
    return %c0_i32, %c0_i32_0 : i32, i32
  }
  func.func @transform_3(%arg0: i32) -> (i32, i32) {
    %c0_i32 = arith.constant 0 : i32
    %c0_i32_0 = arith.constant 0 : i32
    %c0_i32_1 = arith.constant 0 : i32
    return %c0_i32, %c0_i32_0 : i32, i32
  }
  func.func @transform_4(%arg0: i32) -> (i32, i32) {
    %c0_i32 = arith.constant 0 : i32
    %c0_i32_0 = arith.constant 0 : i32
    %c0_i32_1 = arith.constant 0 : i32
    return %c0_i32, %c0_i32_0 : i32, i32
  }
  func.func @transform_5(%arg0: i32) -> (i32, i32) {
    %c0_i32 = arith.constant 0 : i32
    %c0_i32_0 = arith.constant 0 : i32
    return %arg0, %c0_i32 : i32, i32
  }
  func.func @transform_6(%arg0: i32) -> (i32, i32) {
    %c0_i32 = arith.constant 0 : i32
    %c0_i32_0 = arith.constant 0 : i32
    return %arg0, %c0_i32 : i32, i32
  }
}

</mosaic_0001>

<bundles_post_ra>
// kernel: tpu_custom_call.1
= control target key start
LH: loop header
LB: loop body
LE: loop exit
PB: predicated region body
PF: predicated region fallthrough
CT: control target
= control target key end

     0   :  { %12 = vsyncpa [#allocation3], 0  ;;  %s1222_s0 = inlined_call_operand.vmem [shape: f32[128,32], index: 0, kind: input, shape index: {}]   ;;  %s1223_s1 = inlined_call_operand.vmem [shape: bf16[32,128], index: 1, kind: input, shape index: {}]   ;;  %s1224_s2 = inlined_call_operand.vmem [shape: f32[1,128], index: 2, kind: input, shape index: {}]   ;;  %s1225_s3 = inlined_call_operand.vmem [shape: bf16[32,256], index: 3, kind: input, shape index: {}]   ;;  %s1226_s4 = inlined_call_operand.vmem [shape: f32[1,256], index: 4, kind: input, shape index: {}]   ;;  %s1227_s5 = inlined_call_operand.hbm [shape: bf16[128,128], index: 5, kind: output, shape index: {0}]   ;;  %s1228_s6 = inlined_call_operand.hbm [shape: bf16[128,256], index: 6, kind: output, shape index: {1}]  }
   0x1   :  { %14 = vsyncpa [#allocation3 + $0x1], 0 }
   0x2   :  { %15 = vsyncpa [#allocation5], 0 }
   0x3   :  { %17 = vsyncpa [#allocation5 + $0x1], 0  ;;  %s1021_s21 = smov 0   ;;  %s1023_s22 = smov 0  }
   0x4   :  { %s1025_s23 = smov 0   ;;  %s1027_s24 = smov 0  }
   0x5 LB: > { %s1042_s25 = sadd.s32 4294967295, %s977_s24   ;;  %s714_s26 = sadd.s32 4294967294, %s977_s24   ;;  %s977_s24 = sphi %s1027_s24, %s1234_s24   ;;  %s973_s23 = sphi %s1025_s23, %s1233_s23   ;;  %s969_s22 = sphi %s1023_s22, %s1232_s22   ;;  %s965_s21 = sphi %s1021_s21, %s1231_s21  }
   0x6   : > { %s1046_s27 = sadd.s32 1, %s977_s24   ;;  %s140_s28 = sadd.s32 1, %s973_s23 }
   0x7   : > { %s137_s29 = ssub.s32 %s977_s24, %s1046_s27  ;;  %p150_p0 = scmp.ne.s32.totalorder %s973_s23, %s969_s22 }
   0x8   : > { %p138_p1 = scmp.eq.s32.totalorder %s137_s29, 0  ;;  %p151_p2 = scmp.eq.s32.totalorder %s1042_s25, 1 }
   0x9   : > { %p156_p3 = scmp.ne.s32.totalorder %s969_s22, %s965_s21  ;;  %p157_p4 = scmp.eq.s32.totalorder %s714_s26, 1 }
   0xa   : > { %s1057_s30 = scalar_select %p138_p1, %s973_s23, %s140_s28  }
   0xb   : > { %p1059_p5 = por %p151_p2, %p150_p0  ;;  %p1063_p6 = por %p157_p4, %p156_p3 }
   0xc   : > { %p717_p7 = scmp.ge.s32.totalorder %s977_s24, 1  ;;  %p222_p8 = scmp.lt.s32.totalorder %s977_s24, 3 }
   0xe   : > { %p223_p9 = pnand %p717_p7, %p222_p8 }
   0xf   : > { %v875_v0 = vld [vmem:[%s1223_s1] sm:$0xff] (!%p223_p9)   ;;  %s720_s11 = sshll.u32 (!%p223_p9), %s1042_s25, 3  ;;  %v879_v3 = vld [vmem:[%s1223_s1 + $0x8] sm:$0xff] (!%p223_p9)   ;;  %v880_v4 = vld [vmem:[%s1225_s3 + $0x14] ss:$8 sps:$4 sm:$0xff] (!%p223_p9)   ;;  %v979_v6 = vmov (!%p223_p9), 0   ;;  %v385_v19 = vlaneseq (!%p223_p9) }
  0x10   : > { %226 = sbr.rel (%p223_p9) target bundleno = 298 (0x12a), region = 40  ;;  %v876_v1 = vld [vmem:[%s1225_s3 + $0x4] ss:$8 sps:$4 sm:$0xff] (!%p223_p9)   ;;  %p258_p10 = scmp.lt.s32.totalorder (!%p223_p9), %s720_s11, 15  ;;  %810 = vmatprep.subr.bf16.mxu0 (!%p223_p9), %v875_v0  ;;  %v878_v2 = vld [vmem:[%s1225_s3] ss:$8 sps:$4 sm:$0xff] (!%p223_p9)   ;;  %457 = vmatprep.mubr.bf16.mxu1 (!%p223_p9), %v979_v6 }
  0x11   : > { %822 = vmatprep.subr.bf16.mxu1 (!%p223_p9), %v876_v1  ;;  %811 = vmatpush3.bf16.msra.mxu0 (!%p223_p9), %v875_v0  ;;  %v882_v5 = vld [vmem:[%s1225_s3 + $0x10] ss:$8 sps:$4 sm:$0xff] (!%p223_p9)   ;;  %vm301_vm0 = vcmask (!%p223_p9), 261120   ;;  %v386_v20 = vshrl.u32 (!%p223_p9), %v385_v19, 7  ;;  %v383_v22 = vld [vmem:[%s1226_s4] sm:$0x3] (!%p223_p9) }
  0x12   : > { %824 = vmatpush1.bf16.msra.mxu1 (!%p223_p9), %v878_v2  ;;  %812 = vmatprep.subr.bf16.mxu0 (!%p223_p9), %v879_v3  ;;  %s1105_s13 = sand.u32 (!%p223_p9), 1, %s969_s22   ;;  %v722_v27 = vld [vmem:[%s1224_s2] ss:$0 sm:$0xff] (!%p223_p9)  ;;  %s778_s26 = sshll.u32 (!%p223_p9), %s1042_s25, 9 }
  0x13   : > { %823 = vmatprep.subr.bf16.mxu1 (!%p223_p9), %v880_v4  ;;  %v387_v21 = vsub.s32 (!%p223_p9), 0, %v386_v20  ;;  %v391_v23 = vsub.s32 (!%p223_p9), 1, %v386_v20  ;;  %s719_s16 = sshll.u32 (!%p223_p9), %s1105_s13, 6  ;;  %s718_s17 = sshll.u32 (!%p223_p9), %s1105_s13, 5 }
  0x14   : > { %s1118_s18 = scalar_lea.vmem (!%p223_p9), [#allocation4], %s719_s16  ;;  %s249_s19 = scalar_lea.vmem (!%p223_p9), [#allocation2], %s718_s17 }
  0x15   : > { %813 = vmatpush3.bf16.msra.mxu0 (!%p223_p9), %v879_v3  ;;  %v1102_v24 = vrot.slane (!%p223_p9), %v383_v22, %v387_v21  ;;  %v1107_v25 = vrot.slane (!%p223_p9), %v383_v22, %v391_v23  ;;  %s603_s20 = sshll.u32 (!%p223_p9), %s249_s19, 4  ;;  %s1132_s9 = scalar_lea.hbm (!%p223_p9), %s1227_s5, %s778_s26  ;;  %s1126_s20 = int_to_ptr.vmem [resolvable:$true] %s603_s20 }
  0x16   : > { %825 = vmatpush1.bf16.msra.mxu1 (!%p223_p9), %v882_v5  ;;  %415 = vmatprep.subr.bf16.mxu0 (!%p223_p9), %v876_v1  ;;  %s980_s12 = smov (!%p223_p9), [#allocation2]  }
  0x17   : > { %s1236_s11 = smov (!%p258_p10, %s720_s11), 15  ;;  %s887_s14 = sshll.u32 %s980_s12, 4  ;;  %s888_s14 = int_to_ptr.vmem [resolvable:$false] %s887_s14 }
  0x18   : > { %s721_s28 = sshll.u32 %s1236_s11, 3  ;;  %s883_s11 = scalar_lea.vmem %s1126_s20, 512 }
  0x19   : > { %s261_s10 = scalar_lea.vmem %s1222_s0, %s721_s28  ;;  %p884_p11 = scmp.ne.s32.totalorder %s1126_s20, %s883_s11 }
  0x1a   : > { %v266_v7 = vld [vmem:[%s261_s10] sm:$0xff]  ;;  %v267_v8 = vld [vmem:[%s261_s10 + $0x8] sm:$0xff]  ;;  %v268_v9 = vld [vmem:[%s261_s10 + $0x10] sm:$0xff]  ;;  %s889_s15 = scalar_lea.vmem %s888_s14, 1024  ;;  %p890_p0 = scmp.lt.s32.totalorder %s1126_s20, %s888_s14 }
  0x1b   : > { %v274_v10 = vpack.c.bf16 %v267_v8, %v266_v7  ;;  %v269_v11 = vld [vmem:[%s261_s10 + $0x18] sm:$0xff]  ;;  %v270_v12 = vld [vmem:[%s261_s10 + $0x20] sm:$0xff]  ;;  %v271_v13 = vld [vmem:[%s261_s10 + $0x28] sm:$0xff]  ;;  %p885_p12 = pnand %p884_p11, %p1059_p5  ;;  %p891_p1 = scmp.lt.s32.totalorder %s889_s15, %s883_s11 }
  0x1c   : > { %v275_v14 = vpack.c.bf16 %v269_v11, %v268_v9  ;;  %v276_v15 = vpack.c.bf16 %v271_v13, %v270_v12  ;;  %v272_v16 = vld [vmem:[%s261_s10 + $0x30] sm:$0xff]  ;;  %v273_v17 = vld [vmem:[%s261_s10 + $0x38] sm:$0xff]  ;;  %s585_s10 = scalar_lea.sflag [#allocation3], %s1105_s13 }
  0x1d   : > { %814 = vmatprep.mubr.msk.bf16.mxu0 %vm301_vm0, %v274_v10  ;;  %v277_v18 = vpack.c.bf16 %v273_v17, %v272_v16  ;;  %p886_p13 = pneg %p885_p12  ;;  %p892_p2 = por %p891_p1, %p890_p0 }
  0x1e   : > { %815 = vmatmul.mubr.msk.bf16.vlgmr.msra.gmra.mrb[0].mxu0 %vm301_vm0, %v275_v14  ;;  %734 = vmatmul.mubr.msk.bf16.vlgmr.msra.gmra.mrb[0].mxu1 %vm301_vm0, %v275_v14 }
  0x1f   : > { %416 = vmatpush1.bf16.msra.mxu0 %v878_v2  ;;  %818 = vmatprep.mubr.msk.bf16.mxu0 %vm301_vm0, %v276_v15  ;;  %p893_p3 = pnand %p892_p2, %p886_p13 }
  0x20   : > { %467 = vmatprep.mubr.bf16.mxu1 %v979_v6  ;;  %417 = vmatprep.subr.bf16.mxu0 %v880_v4 }
  0x23   : > { %418 = vmatpush1.bf16.msra.mxu0 %v882_v5 }
  0x26   : > { %819 = vmatmul.mubr.msk.bf16.gmra.mrb[4].mxu0 %vm301_vm0, %v277_v18  ;;  %735 = vmatmul.mubr.msk.bf16.gmra.mrb[4].mxu1 %vm301_vm0, %v276_v15 }
  0x27   : > { %447 = vmatprep.mubr.bf16.mxu0 %v979_v6  ;;  %477 = vmatprep.mubr.bf16.mxu1 %v979_v6 }
  0x2e   : > { %733 = vmatmul.mubr.msk.bf16.vlgmr.msra.gmra.mrb[8].mxu0 %vm301_vm0, %v274_v10  ;;  %736 = vmatmul.mubr.msk.bf16.gmra.mrb[8].mxu1 %vm301_vm0, %v277_v18 }
  0xf1   : > { %v816_v26 = vpop.f32.mrb[0].mxu0  ;;  %v459_v28 = vpop.f32.mrb[0].mxu1 }
  0xf2   : > { %v460_v29 = vadd.f32 %v459_v28, %v1102_v24  ;;  %v348_v30 = vpop.f32.mrb[1].mxu0  ;;  %v461_v31 = vpop.f32.mrb[1].mxu1  ;;  %v357_v35 = vadd.f32 %v816_v26, %v722_v27 }
  0xf3   : > { %v462_v32 = vadd.f32 %v461_v31, %v1107_v25  ;;  %v817_v33 = vpop.f32.mrb[2].mxu0  ;;  %v463_v34 = vpop.f32.mrb[2].mxu1  ;;  %v349_v40 = vadd.f32 %v722_v27, %v348_v30 }
  0xf4   : > { %v360_v36 = vadd.f32 %v817_v33, %v722_v27  ;;  %v464_v37 = vadd.f32 %v463_v34, %v1102_v24  ;;  %v351_v38 = vpop.f32.mrb[3].mxu0  ;;  %v465_v39 = vpop.f32.mrb[3].mxu1 }
  0xf5   : > { %v772_v41 = vpack.c.bf16 %v462_v32, %v460_v29  ;;  %v352_v42 = vadd.f32 %v722_v27, %v351_v38  ;;  %v466_v43 = vadd.f32 %v465_v39, %v1107_v25 }
  0xf6   : > { %v789_v44 = vpack.c.bf16 %v360_v36, %v357_v35 }
  0xf7   : > { %578 = vst [vmem:[%s1118_s18 + $0x10] sm:$0xff] %v772_v41  ;;  %v784_v45 = vpack.c.bf16 %v352_v42, %v349_v40  ;;  %v773_v46 = vpack.c.bf16 %v466_v43, %v464_v37 }
  0xf8   : > { %801 = vst [vmem:[%s249_s19 + $0x8] sm:$0xff] %v789_v44  }
  0xf9   : > { %785 = vst [vmem:[%s249_s19] sm:$0xff] %v784_v45   ;;  %579 = vst [vmem:[%s1118_s18 + $0x18] sm:$0xff] %v773_v46  ;;  %v820_v47 = vpop.f32.mrb[4].mxu0  ;;  %v469_v48 = vpop.f32.mrb[4].mxu1 }
  0xfa   : > { %v470_v49 = vadd.f32 %v469_v48, %v1102_v24  ;;  %v364_v50 = vpop.f32.mrb[5].mxu0  ;;  %v471_v51 = vpop.f32.mrb[5].mxu1  ;;  %v373_v55 = vadd.f32 %v820_v47, %v722_v27 }
  0xfb   : > { %v472_v52 = vadd.f32 %v471_v51, %v1107_v25  ;;  %v821_v53 = vpop.f32.mrb[6].mxu0  ;;  %v473_v54 = vpop.f32.mrb[6].mxu1  ;;  %v365_v60 = vadd.f32 %v722_v27, %v364_v50 }
  0xfc   : > { %v376_v56 = vadd.f32 %v821_v53, %v722_v27  ;;  %v474_v57 = vadd.f32 %v473_v54, %v1102_v24  ;;  %v367_v58 = vpop.f32.mrb[7].mxu0  ;;  %v475_v59 = vpop.f32.mrb[7].mxu1 }
  0xfd   : > { %v774_v61 = vpack.c.bf16 %v472_v52, %v470_v49  ;;  %v368_v62 = vadd.f32 %v722_v27, %v367_v58  ;;  %v476_v63 = vadd.f32 %v475_v59, %v1107_v25 }
  0xfe   : > { %v799_v0 = vpack.c.bf16 %v376_v56, %v373_v55 }
  0xff   : > { %580 = vst [vmem:[%s1118_s18 + $0x20] sm:$0xff] %v774_v61  ;;  %v794_v1 = vpack.c.bf16 %v368_v62, %v365_v60  ;;  %v775_v2 = vpack.c.bf16 %v476_v63, %v474_v57 }
 0x100   : > { %803 = vst [vmem:[%s249_s19 + $0x18] sm:$0xff] %v799_v0  }
 0x101   : > { %802 = vst [vmem:[%s249_s19 + $0x10] sm:$0xff] %v794_v1   ;;  %581 = vst [vmem:[%s1118_s18 + $0x28] sm:$0xff] %v775_v2  ;;  %v449_v3 = vpop.f32.mrb[8].mxu0  ;;  %v479_v4 = vpop.f32.mrb[8].mxu1 }
 0x102   : > { %v450_v5 = vadd.f32 %v449_v3, %v1102_v24  ;;  %v480_v6 = vadd.f32 %v479_v4, %v1102_v24  ;;  %v451_v7 = vpop.f32.mrb[9].mxu0  ;;  %v481_v8 = vpop.f32.mrb[9].mxu1 }
 0x103   : > { %896 = shalt.err (!%p893_p3)
}
 0x104   : > { %s897_s16 = scalar_lea.hbm %s1132_s9, 512  ;;  %s901_s26 = scalar_lea.hbm %s1227_s5, 1024 }
 0x105   : > { %p898_p4 = scmp.ne.s32.totalorder %s1132_s9, %s897_s16  ;;  %p902_p9 = scmp.lt.u32.totalorder %s1132_s9, %s1227_s5 }
 0x106   : > { %p903_p10 = scmp.lt.u32.totalorder %s901_s26, %s897_s16  ;;  %p905_p12 = scmp.lt.u32.totalorder %s897_s16, %s1132_s9 }
 0x107   : > { %p899_p7 = pnand %p898_p4, %p1059_p5 }
 0x108   : > { %p904_p11 = por %p903_p10, %p902_p9 }
 0x109   : > { %p900_p8 = pneg %p899_p7 }
 0x10a   : > { %p906_p13 = por %p905_p12, %p904_p11 }
 0x10c   : > { %p907_p0 = pnand %p906_p13, %p900_p8 }
 0x10e   : > { %910 = shalt.err (!%p907_p0)
}
 0x10f   : > { %s981_s11 = smov 64   ;;  %s982_s12 = smov 4   ;;  %v452_v9 = vadd.f32 %v451_v7, %v1107_v25  ;;  %v482_v10 = vadd.f32 %v481_v8, %v1107_v25  ;;  %v453_v11 = vpop.f32.mrb[10].mxu0  ;;  %v483_v12 = vpop.f32.mrb[10].mxu1 }
 0x110   : > { %826 = dma.vmem_to_hbm [thread:$0]  (%p1059_p5), %s1126_s20, 512, %s1132_s9, %s585_s10, %s981_s11, %s981_s11, %s982_s12   ;;  %v454_v13 = vadd.f32 %v453_v11, %v1102_v24  ;;  %v484_v14 = vadd.f32 %v483_v12, %v1102_v24  ;;  %v455_v15 = vpop.f32.mrb[11].mxu0  ;;  %v485_v16 = vpop.f32.mrb[11].mxu1 }
 0x111   : > { %s780_s14 = sshll.u32 %s1042_s25, 10  ;;  %s620_s15 = sshll.u32 %s1118_s18, 4  ;;  %v770_v17 = vpack.c.bf16 %v452_v9, %v450_v5  ;;  %v776_v18 = vpack.c.bf16 %v482_v10, %v480_v6  ;;  %v456_v19 = vadd.f32 %v455_v15, %v1107_v25  ;;  %v486_v20 = vadd.f32 %v485_v16, %v1107_v25  ;;  %s1175_s15 = int_to_ptr.vmem [resolvable:$true] %s620_s15 }
 0x112   : > { %s1173_s25 = scalar_lea.hbm %s1228_s6, %s780_s14  ;;  %s590_s10 = scalar_lea.sflag [#allocation5], %s1105_s13 }
 0x113   : > { %576 = vst [vmem:[%s1118_s18] sm:$0xff] %v770_v17  ;;  %582 = vst [vmem:[%s1118_s18 + $0x30] sm:$0xff] %v776_v18  ;;  %v771_v21 = vpack.c.bf16 %v456_v19, %v454_v13  ;;  %v777_v22 = vpack.c.bf16 %v486_v20, %v484_v14  ;;  %s911_s16 = scalar_lea.vmem %s1175_s15, 1024  ;;  %s983_s17 = smov [#allocation4]  }
 0x114   : > { %p912_p1 = scmp.ne.s32.totalorder %s1175_s15, %s911_s16  ;;  %s915_s19 = sshll.u32 %s983_s17, 4  ;;  %s916_s19 = int_to_ptr.vmem [resolvable:$false] %s915_s19 }
 0x115   : > { %577 = vst [vmem:[%s1118_s18 + $0x8] sm:$0xff] %v771_v21  ;;  %583 = vst [vmem:[%s1118_s18 + $0x38] sm:$0xff] %v777_v22  ;;  %s917_s26 = scalar_lea.vmem %s916_s19, 2048  ;;  %p918_p4 = scmp.lt.s32.totalorder %s1175_s15, %s916_s19 }
 0x116   : > { %p913_p2 = pnand %p912_p1, %p1059_p5  ;;  %p919_p7 = scmp.lt.s32.totalorder %s917_s26, %s911_s16 }
 0x118   : > { %p914_p3 = pneg %p913_p2  ;;  %p920_p8 = por %p919_p7, %p918_p4 }
 0x11a   : > { %p921_p9 = pnand %p920_p8, %p914_p3 }
 0x11c   : > { %924 = shalt.err (!%p921_p9)
}
 0x11d   : > { %s925_s18 = scalar_lea.hbm %s1173_s25, 1024  ;;  %s929_s11 = scalar_lea.hbm %s1228_s6, 2048 }
 0x11e   : > { %p926_p10 = scmp.ne.s32.totalorder %s1173_s25, %s925_s18  ;;  %p930_p13 = scmp.lt.u32.totalorder %s1173_s25, %s1228_s6 }
 0x11f   : > { %p931_p0 = scmp.lt.u32.totalorder %s929_s11, %s925_s18  ;;  %p933_p2 = scmp.lt.u32.totalorder %s925_s18, %s1173_s25 }
 0x120   : > { %p927_p11 = pnand %p926_p10, %p1059_p5 }
 0x121   : > { %p932_p1 = por %p931_p0, %p930_p13 }
 0x122   : > { %p928_p12 = pneg %p927_p11 }
 0x123   : > { %p934_p3 = por %p933_p2, %p932_p1 }
 0x125   : > { %p935_p4 = pnand %p934_p3, %p928_p12 }
 0x127   : > { %938 = shalt.err (!%p935_p4)
}
 0x128   : > { %s984_s20 = smov 128   ;;  %s985_s9 = smov 8  }
 0x129   : > { %827 = dma.vmem_to_hbm [thread:$0]  (%p1059_p5), %s1175_s15, 1024, %s1173_s25, %s590_s10, %s984_s20, %s984_s20, %s985_s9  }
 0x12a PF: > { %p837_p7 = scmp.ge.s32.totalorder %s977_s24, 2  ;;  %s635_s16 = sand.u32 1, %s965_s21  }
 0x12b   : > { %s636_s17 = scalar_lea.sflag [#allocation3], %s635_s16 }
 0x12c   : > { %p831_p8 = pnand %p837_p7, %p1063_p6 }
 0x12e   : > { %956 = dma.done.wait (!%p831_p8), %s636_s17, 512  }
 0x12f   : > { %958 = vsyncadd (!%p831_p8), %s636_s17, 4294966784  ;;  %s645_s19 = scalar_lea.sflag [#allocation5], %s635_s16 }
 0x130   : > { %960 = dma.done.wait (!%p831_p8), %s645_s19, 1024  }
 0x131   : > { %962 = vsyncadd (!%p831_p8), %s645_s19, 4294966272  ;;  %p20_p5 = scmp.ge.s32.totalorder %s1046_s27, 4   ;;  %s1231_s21 = smov %s969_s22 }
 0x132   : > { %s1232_s22 = smov %s973_s23  ;;  %s1233_s23 = smov %s1057_s30 }
 0x133   : > { %s1234_s24 = smov %s1046_s27  ;;  %22 = sbr.rel (!%p20_p5) target bundleno = 5 (0x5), region = 92 }
 0x13a   :  { %650 = vsyncpa [#allocation3], 1 }
 0x13b   :  { %652 = vsyncpa [#allocation3 + $0x1], 1 }
 0x13c   :  { %653 = vsyncpa [#allocation5], 1 }
 0x13d   :  { %655 = vsyncpa [#allocation5 + $0x1], 1 }

</bundles_post_ra>
